<compile_context>
chip_gen: v5e
topology: v5e:2x2
jax: 0.10.0
libtpu: 0.0.40
codegen_flags: <defaults>
</compile_context>

<pallas_src>
import functools

import jax
import jax.numpy as jnp
from jax.experimental import pallas as pl
from jax.experimental.pallas import tpu as pltpu


def _coord_latent_kernel(x_ref, w_ref, o_ref, *, ndim_p1, apply_tanh):
    """One grid step == one (batch, N-tile) block in transposed layout.

    x_ref : (1, ndim+1, TN)        x^T tile with a trailing ones row
    w_ref : (1, ndim+1, out_dim,1) [w_coord^T cols | fc_latent(z)+bias] columns
    o_ref : (1, out_dim, TN)       transposed output tile
    """
    x = x_ref[0]                                   # (ndim+1, TN), N on lanes
    w = w_ref[0]                                   # (ndim+1, out_dim, 1)
    # ndim+1 VPU broadcast FMAs: (out_dim,1) * (1,TN) -> (out_dim,TN).
    h = w[0] * x[0:1, :]
    for d in range(1, ndim_p1):                    # static loop (ndim static)
        h = h + w[d] * x[d:d + 1, :]
    if apply_tanh:
        h = jnp.tanh(h)                            # EUP slot, effectively free
    o_ref[0] = h.astype(o_ref.dtype)


def coord_latent_forward_t(x_coord_t, z, w_coord, b_coord, w_latent,
                           activation_out: bool = True,
                           out_dtype=None, tn_cap: int = 2048):
    """Kernel-native entry point (recommended for fused pipelines).

    x_coord_t: (B, ndim, N)  coordinates already in lane-dense layout
    z        : (B, latent_dim)
    w_coord  : (out_dim, ndim), b_coord: (out_dim,), w_latent: (out_dim, latent)
    Returns (B, out_dim, N) -- transposed output, no extra HBM round trips.
    """
    B, ndim, N = x_coord_t.shape
    out_dim = w_coord.shape[0]
    if out_dtype is None:
        out_dtype = x_coord_t.dtype   # bf16 here halves store traffic on v6e/v7x

    # Pad N to a multiple of 128 so the lane axis stays full-width/unmasked.
    n_pad = ((N + 127) // 128) * 128
    if n_pad != N:
        x_coord_t = jnp.pad(x_coord_t, ((0, 0), (0, 0), (0, n_pad - N)))

    # Fold the latent/bias column into the coord FMA loop: append a ones row
    # to x^T and stack [w_coord^T | fc_latent(z) + b_coord] per batch element.
    ones = jnp.ones((B, 1, n_pad), x_coord_t.dtype)
    x_aug = jnp.concatenate([x_coord_t, ones], axis=1)          # (B, ndim+1, Np)

    hz_b = z @ w_latent.T + b_coord                             # (B, out_dim)
    wc = jnp.broadcast_to(w_coord.T[None], (B, ndim, out_dim))  # (B, ndim, out)
    w_all = jnp.concatenate([wc, hz_b[:, None, :]], axis=1)     # (B, ndim+1, out)
    w_all = w_all.reshape(B, ndim + 1, out_dim, 1).astype(x_coord_t.dtype)

    # N-tile size: multiple of 128 dividing n_pad, capped to keep the
    # double-buffered (out_dim, TN) f32 output tile well inside v7x VMEM.
    tn = min(n_pad, tn_cap)
    while n_pad % tn:
        tn -= 128

    kernel = functools.partial(_coord_latent_kernel,
                               ndim_p1=ndim + 1, apply_tanh=activation_out)

    out_t = pl.pallas_call(
        kernel,
        out_shape=jax.ShapeDtypeStruct((B, out_dim, n_pad), out_dtype),
        grid_spec=pltpu.PrefetchScalarGridSpec(
            num_scalar_prefetch=0,
            grid=(B, n_pad // tn),              # b outer, n inner (weights reused)
            in_specs=[
                pl.BlockSpec((1, ndim + 1, tn), lambda b, n: (b, 0, n)),
                pl.BlockSpec((1, ndim + 1, out_dim, 1),
                             lambda b, n: (b, 0, 0, 0)),
            ],
            out_specs=pl.BlockSpec((1, out_dim, tn), lambda b, n: (b, 0, n)),
        ),
        compiler_params=pltpu.CompilerParams(
            dimension_semantics=("parallel", "parallel")),
    )(x_aug, w_all)

    return out_t[:, :, :N]   # drop N padding (no-op if N was already aligned)


def coord_latent_forward(x_coord, z, w_coord, b_coord, w_latent,
                         activation_out: bool = True):
    """PyTorch-compatible interface: x_coord (B, N, ndim) -> (B*N, out_dim).

    The input/output transposes here are only for interface parity with the
    nn.Module; downstream consumers should prefer coord_latent_forward_t and
    keep the lane-dense (B, out_dim, N) layout end to end.
    """
    B, N, _ = x_coord.shape
    x_t = jnp.transpose(x_coord, (0, 2, 1))                      # (B, ndim, N)
    out_t = coord_latent_forward_t(x_t, z, w_coord, b_coord, w_latent,
                                   activation_out)
    return jnp.transpose(out_t, (0, 2, 1)).reshape(B * N, -1)


def _reference_forward(x_coord, z, w_coord, b_coord, w_latent,
                       activation_out: bool = True):
    B, N, _ = x_coord.shape
    h_x = x_coord.reshape(B * N, -1) @ w_coord.T + b_coord
    h_x = h_x.reshape(B, N, -1)
    h_z = z @ w_latent.T
    h = (h_x + h_z[:, None, :]).reshape(B * N, -1)
    return jnp.tanh(h) if activation_out else h


if __name__ == "__main__":
    # Module hyperparameters (small, consistent with the forward pass).
    B = 2            # batch
    H = W = 16       # spatial grid -> N coordinate points
    N = H * W        # 256
    NDIM = 2         # coordinate dimensionality
    LATENT_DIM = 8
    OUT_DIM = 32

    key = jax.random.PRNGKey(0)
    k_x, k_z, k_wc, k_bc, k_wl, k_x2 = jax.random.split(key, 6)

    # Inputs.
    x_coord = jax.random.normal(k_x, (B, N, NDIM), dtype=jnp.float32)
    z = jax.random.normal(k_z, (B, LATENT_DIM), dtype=jnp.float32)

    # Parameters (PyTorch nn.Linear weight layout: (out, in)).
    w_coord = 0.1 * jax.random.normal(k_wc, (OUT_DIM, NDIM), dtype=jnp.float32)
    b_coord = 0.1 * jax.random.normal(k_bc, (OUT_DIM,), dtype=jnp.float32)
    w_latent = 0.1 * jax.random.normal(k_wl, (OUT_DIM, LATENT_DIM),
                                       dtype=jnp.float32)

    # Default path (activation_out=True, i.e. tanh).
    out = coord_latent_forward(x_coord, z, w_coord, b_coord, w_latent)
    out = jax.block_until_ready(out)
    ref = _reference_forward(x_coord, z, w_coord, b_coord, w_latent)
    assert out.shape == (B * N, OUT_DIM)
    assert jnp.allclose(out, ref, atol=1e-5, rtol=1e-5)

    # activation_out=False path (no tanh).
    out_na = coord_latent_forward(x_coord, z, w_coord, b_coord, w_latent,
                                  activation_out=False)
    out_na = jax.block_until_ready(out_na)
    ref_na = _reference_forward(x_coord, z, w_coord, b_coord, w_latent,
                                activation_out=False)
    assert jnp.allclose(out_na, ref_na, atol=1e-5, rtol=1e-5)

    # Ragged-N path (20x20 grid -> N=400, padded to 512 inside the wrapper).
    N2 = 400
    x_coord2 = jax.random.normal(k_x2, (B, N2, NDIM), dtype=jnp.float32)
    out2 = coord_latent_forward(x_coord2, z, w_coord, b_coord, w_latent)
    out2 = jax.block_until_ready(out2)
    ref2 = _reference_forward(x_coord2, z, w_coord, b_coord, w_latent)
    assert out2.shape == (B * N2, OUT_DIM)
    assert jnp.allclose(out2, ref2, atol=1e-5, rtol=1e-5)

    print("KERNEL_OK")
</pallas_src>

<mosaic_0001>
module attributes {stable_mosaic.version = 11 : i64} {
  func.func @_coord_latent_kernel(%arg0: i32, %arg1: i32, %arg2: memref<1x3x256xf32, #tpu.memory_space<vmem>>, %arg3: memref<1x3x32x1xf32, #tpu.memory_space<vmem>>, %arg4: memref<1x32x256xf32, #tpu.memory_space<vmem>>) attributes {dimension_semantics = [#tpu.dimension_semantics<parallel>, #tpu.dimension_semantics<parallel>], iteration_bounds = array<i64: 2, 1>, scalar_prefetch = 0 : i64, scratch_operands = 0 : i64, tpu.core_type = #tpu.core_type<tc>, window_params = [{transform_indices = @transform_0, window_bounds = array<i64: 1, 3, 256>}, {transform_indices = @transform_1, window_bounds = array<i64: 1, 3, 32, 1>}, {transform_indices = @transform_2, window_bounds = array<i64: 1, 32, 256>}]} {
    %c0 = arith.constant 0 : index
    %c0_0 = arith.constant 0 : index
    %c0_1 = arith.constant 0 : index
    %0 = vector.load %arg2[%c0, %c0_0, %c0_1] : memref<1x3x256xf32, #tpu.memory_space<vmem>>, vector<1x3x256xf32>
    %1 = vector.shape_cast %0 : vector<1x3x256xf32> to vector<3x256xf32>
    %c0_2 = arith.constant 0 : index
    %c0_3 = arith.constant 0 : index
    %c0_4 = arith.constant 0 : index
    %c0_5 = arith.constant 0 : index
    %2 = vector.load %arg3[%c0_2, %c0_3, %c0_4, %c0_5] : memref<1x3x32x1xf32, #tpu.memory_space<vmem>>, vector<1x3x32x1xf32>
    %3 = vector.shape_cast %2 : vector<1x3x32x1xf32> to vector<3x32x1xf32>
    %4 = vector.extract_strided_slice %3 {offsets = [0, 0, 0], sizes = [1, 32, 1], strides = [1, 1, 1]} : vector<3x32x1xf32> to vector<1x32x1xf32>
    %5 = vector.shape_cast %4 : vector<1x32x1xf32> to vector<32x1xf32>
    %6 = vector.extract_strided_slice %1 {offsets = [0, 0], sizes = [1, 256], strides = [1, 1]} : vector<3x256xf32> to vector<1x256xf32>
    %7 = vector.broadcast %5 : vector<32x1xf32> to vector<32x256xf32>
    %8 = vector.broadcast %6 : vector<1x256xf32> to vector<32x256xf32>
    %9 = arith.mulf %7, %8 : vector<32x256xf32>
    %10 = vector.extract_strided_slice %3 {offsets = [1, 0, 0], sizes = [1, 32, 1], strides = [1, 1, 1]} : vector<3x32x1xf32> to vector<1x32x1xf32>
    %11 = vector.shape_cast %10 : vector<1x32x1xf32> to vector<32x1xf32>
    %12 = vector.extract_strided_slice %1 {offsets = [1, 0], sizes = [1, 256], strides = [1, 1]} : vector<3x256xf32> to vector<1x256xf32>
    %13 = vector.broadcast %11 : vector<32x1xf32> to vector<32x256xf32>
    %14 = vector.broadcast %12 : vector<1x256xf32> to vector<32x256xf32>
    %15 = arith.mulf %13, %14 : vector<32x256xf32>
    %16 = arith.addf %9, %15 : vector<32x256xf32>
    %17 = vector.extract_strided_slice %3 {offsets = [2, 0, 0], sizes = [1, 32, 1], strides = [1, 1, 1]} : vector<3x32x1xf32> to vector<1x32x1xf32>
    %18 = vector.shape_cast %17 : vector<1x32x1xf32> to vector<32x1xf32>
    %19 = vector.extract_strided_slice %1 {offsets = [2, 0], sizes = [1, 256], strides = [1, 1]} : vector<3x256xf32> to vector<1x256xf32>
    %20 = vector.broadcast %18 : vector<32x1xf32> to vector<32x256xf32>
    %21 = vector.broadcast %19 : vector<1x256xf32> to vector<32x256xf32>
    %22 = arith.mulf %20, %21 : vector<32x256xf32>
    %23 = arith.addf %16, %22 : vector<32x256xf32>
    %24 = math.tanh %23 : vector<32x256xf32>
    %c0_6 = arith.constant 0 : index
    %c0_7 = arith.constant 0 : index
    %c0_8 = arith.constant 0 : index
    %25 = vector.load %arg4[%c0_6, %c0_7, %c0_8] : memref<1x32x256xf32, #tpu.memory_space<vmem>>, vector<1x32x256xf32>
    %26 = vector.shape_cast %25 : vector<1x32x256xf32> to vector<32x256xf32>
    %27 = vector.shape_cast %24 : vector<32x256xf32> to vector<1x32x256xf32>
    tpu.vector_store %arg4[%c0_6, %c0_7, %c0_8], %27 {strides = array<i32>} : memref<1x32x256xf32, #tpu.memory_space<vmem>>, vector<1x32x256xf32>,
    return
  }
  func.func @transform_0(%arg0: i32, %arg1: i32) -> (i32, i32, i32) {
    %c0_i32 = arith.constant 0 : i32
    %c0_i32_0 = arith.constant 0 : i32
    return %arg0, %c0_i32, %arg1 : i32, i32, i32
  }
  func.func @transform_1(%arg0: i32, %arg1: i32) -> (i32, i32, i32, i32) {
    %c0_i32 = arith.constant 0 : i32
    %c0_i32_0 = arith.constant 0 : i32
    %c0_i32_1 = arith.constant 0 : i32
    %c0_i32_2 = arith.constant 0 : i32
    return %arg0, %c0_i32, %c0_i32_0, %c0_i32_1 : i32, i32, i32, i32
  }
  func.func @transform_2(%arg0: i32, %arg1: i32) -> (i32, i32, i32) {
    %c0_i32 = arith.constant 0 : i32
    %c0_i32_0 = arith.constant 0 : i32
    return %arg0, %c0_i32, %arg1 : i32, i32, i32
  }
}

</mosaic_0001>

<bundles_post_ra>
// kernel: tpu_custom_call.1
= control target key start
LH: loop header
LB: loop body
LE: loop exit
PB: predicated region body
PF: predicated region fallthrough
CT: control target
= control target key end

     0   :  { %7 = vsyncpa [#allocation3], 0  ;;  %s761_s0 = inlined_call_operand.vmem [shape: f32[2,3,256], index: 0, kind: input, shape index: {}]   ;;  %s762_s1 = inlined_call_operand.vmem [shape: f32[2,3,32,1], index: 1, kind: input, shape index: {}]   ;;  %s763_s2 = inlined_call_operand.hbm [shape: f32[2,32,256], index: 2, kind: output, shape index: {}]  }
   0x1   :  { %9 = vsyncpa [#allocation3 + $0x1], 0  ;;  %s642_s9 = smov 0   ;;  %s644_s10 = smov 0  }
   0x2   :  { %s646_s11 = smov 0   ;;  %s648_s12 = smov 0  }
   0x3   :  { %s650_s13 = smov 0   ;;  %s652_s14 = smov 0  }
   0x4 LB: > { %s450_s15 = sadd.s32 4294967295, %s622_s14   ;;  %s451_s16 = sadd.s32 4294967294, %s622_s14   ;;  %s622_s14 = sphi %s652_s14, %s15_s14   ;;  %s618_s13 = sphi %s650_s13, %s770_s13   ;;  %s614_s12 = sphi %s648_s12, %s769_s12   ;;  %s610_s11 = sphi %s646_s11, %s768_s11   ;;  %s606_s10 = sphi %s644_s10, %s767_s10   ;;  %s602_s9 = sphi %s642_s9, %s766_s9  }
   0x5   : > { %s27_s17 = sadd.s32 1, %s618_s13  ;;  %s90_s18 = sadd.s32 1, %s610_s11 }
   0x6   : > { %p29_p0 = scmp.ge.s32.totalorder %s27_s17, 2  ;;  %p100_p1 = scmp.ne.s32.totalorder %s610_s11, %s606_s10 }
   0x7   : > { %p101_p2 = scmp.eq.s32.totalorder %s450_s15, 1  ;;  %p106_p3 = scmp.ne.s32.totalorder %s606_s10, %s602_s9 }
   0x8   : > { %s772_s17 = smov (%p29_p0, %s27_s17), 0  ;;  %p107_p5 = scmp.eq.s32.totalorder %s451_s16, 1 }
   0x9   : > { %p682_p4 = por %p101_p2, %p100_p1  ;;  %s85_s20 = ssub.s32 %s618_s13, %s772_s17 }
   0xa   : > { %p454_p6 = scmp.ge.s32.totalorder %s622_s14, 1  ;;  %p88_p7 = scmp.eq.s32.totalorder %s85_s20, 0 }
   0xb   : > { %p689_p8 = por %p107_p5, %p106_p3  ;;  %p146_p9 = scmp.lt.s32.totalorder %s622_s14, 3 }
   0xc   : > { %s695_s22 = scalar_select %p88_p7, %s610_s11, %s90_s18  }
   0xd   : > { %p147_p10 = pnand %p454_p6, %p146_p9 }
   0xe   : > { %p178_p11 = scmp.lt.s32.totalorder (!%p147_p10), %s614_s12, 1  ;;  %s174_s4 = sand.u32 (!%p147_p10), 1, %s606_s10  }
   0xf   : > { %150 = sbr.rel (%p147_p10) target bundleno = 183 (0xb7), region = 28  ;;  %s455_s5 = sshll.u32 (!%p147_p10), %s174_s4, 6 }
  0x10   : > { %s712_s6 = scalar_lea.vmem (!%p147_p10), [#allocation2], %s455_s5  ;;  %s465_s7 = sshll.u32 (!%p147_p10), %s614_s12, 6 }
  0x11   : > { %s355_s16 = scalar_lea.hbm (!%p147_p10), %s763_s2, %s465_s7  ;;  %s342_s20 = scalar_lea.sflag (!%p147_p10), [#allocation3], %s174_s4 }
  0x12   : > { %s358_s18 = sshll.u32 (!%p147_p10), %s355_s16, 4  ;;  %s359_s18 = int_to_ptr.hbm [resolvable:$true] %s358_s18 }
  0x14   : > { %v624_v0 = vmov 0   ;;  %s699_s23 = scalar_select %p178_p11, %s614_s12, 1 }
  0x15   : > { %527 = vset.pattern.permute.xlu2 %v624_v0  ;;  %526 = vset.pattern.permute.xlu1 %v624_v0  ;;  %s356_s12 = sshll.u32 %s712_s6, 4  ;;  %s357_s12 = int_to_ptr.vmem [resolvable:$true] %s356_s12 }
  0x16   : > { %525 = vset.pattern.permute.xlu0 %v624_v0  ;;  %s466_s24 = smul.u32 96, %s699_s23  ;;  %s464_s28 = sshll.u32 %s699_s23, 3 }
  0x17   : > { %s185_s3 = scalar_lea.vmem %s761_s0, %s464_s28  ;;  %s558_s23 = sshra.s32 %s359_s18, 4  ;;  %s559_s23 = int_to_ptr.hbm [resolvable:$true] %s558_s23 }
  0x18   : > { %s191_s27 = scalar_lea.vmem %s762_s1, %s466_s24  ;;  %v193_v14 = vld [vmem:[%s185_s3] sm:$0x77]  ;;  %s560_s24 = scalar_lea.hbm %s559_s23, 64 }
  0x19   : > { %v198_v1 = vld [vmem:[%s191_s27 + $0x20] sm:$0xff]  ;;  %v196_v2 = vld [vmem:[%s191_s27 + $0x10] sm:$0xff]  ;;  %v199_v4 = vld [vmem:[%s191_s27 + $0x28] sm:$0xff]  ;;  %v261_v15 = vperm.slane %v193_v14, 1  ;;  %v262_v16 = vperm.slane %v193_v14, 5  ;;  %v227_v18 = vperm.slane %v193_v14, 0  ;;  %p561_p12 = scmp.ne.s32.totalorder %s559_s23, %s560_s24  ;;  %p565_p1 = scmp.lt.s32.totalorder %s559_s23, %s763_s2 }
  0x1a   : > { %v194_v3 = vld [vmem:[%s191_s27] sm:$0xff]  ;;  %243 = vperm.xlu2 %527, %v198_v1   ;;  %218 = vperm.xlu1 %526, %v196_v2   ;;  %v197_v5 = vld [vmem:[%s191_s27 + $0x18] sm:$0xff]  ;;  %v195_v6 = vld [vmem:[%s191_s27 + $0x8] sm:$0xff]  ;;  %v228_v19 = vperm.slane %v193_v14, 4  ;;  %v303_v22 = vperm.slane %v193_v14, 2  ;;  %v304_v23 = vperm.slane %v193_v14, 6 }
  0x1b   : > { %208 = vperm.xlu0 %525, %v194_v3   ;;  %v202_v7 = vld [vmem:[%s191_s27 + $0x40] sm:$0xff]  ;;  %v201_v8 = vld [vmem:[%s191_s27 + $0x38] sm:$0xff]  ;;  %v200_v9 = vld [vmem:[%s191_s27 + $0x30] sm:$0xff]  ;;  %v265_v20 = vperm.slane %v261_v15, 1  ;;  %v266_v21 = vperm.slane %v262_v16, 1  ;;  %v231_v24 = vperm.slane %v227_v18, 0  ;;  %p562_p13 = pnand %p561_p12, %p682_p4 }
  0x1c   : > { %v205_v10 = vld [vmem:[%s191_s27 + $0x58] sm:$0xff]  ;;  %v204_v11 = vld [vmem:[%s191_s27 + $0x50] sm:$0xff]  ;;  %v203_v12 = vld [vmem:[%s191_s27 + $0x48] sm:$0xff]  ;;  %v232_v25 = vperm.slane %v228_v19, 0  ;;  %v307_v28 = vperm.slane %v303_v22, 2  ;;  %v308_v29 = vperm.slane %v304_v23, 2 }
  0x1d   : > { %p563_p0 = pneg %p562_p13  ;;  %s564_s27 = scalar_lea.hbm %s763_s2, 128 }
  0x1e   : > { %p566_p2 = scmp.lt.s32.totalorder %s564_s27, %s560_s24 }
  0x20   : > { %p567_p3 = por %p566_p2, %p565_p1 }
  0x22   : > { %248 = vperm.xlu2 %527, %v199_v4   ;;  %223 = vperm.xlu1 %526, %v197_v5   ;;  %p568_p5 = pnand %p567_p3, %p563_p0 }
  0x23   : > { %213 = vperm.xlu0 %525, %v195_v6  }
  0x2a   : > { %285 = vperm.xlu2 %527, %v202_v7   ;;  %258 = vperm.xlu1 %526, %v201_v8  }
  0x2b   : > { %253 = vperm.xlu0 %525, %v200_v9  }
  0x32   : > { %300 = vperm.xlu2 %527, %v205_v10   ;;  %295 = vperm.xlu1 %526, %v204_v11  }
  0x33   : > { %290 = vperm.xlu0 %525, %v203_v12  }
  0x74   : > { %v244_v13 = vpop.permute.xlu2 %243 }
  0x75   : > { %v267_v26 = vmul.f32 %v265_v20, %v244_v13  ;;  %v268_v27 = vmul.f32 %v266_v21, %v244_v13 }
  0x7c   : > { %v249_v17 = vpop.permute.xlu2 %248 }
  0x7d   : > { %v269_v0 = vmul.f32 %v265_v20, %v249_v17  ;;  %v270_v1 = vmul.f32 %v266_v21, %v249_v17 }
  0x84   : > { %v286_v34 = vpop.permute.xlu2 %285 }
  0x85   : > { %v309_v35 = vmul.f32 %v307_v28, %v286_v34  ;;  %v310_v36 = vmul.f32 %v308_v29, %v286_v34 }
  0x8c   : > { %v219_v30 = vpop.permute.xlu1 %218  ;;  %v301_v45 = vpop.permute.xlu2 %300 }
  0x8d   : > { %v209_v31 = vpop.permute.xlu0 %208  ;;  %v315_v52 = vmul.f32 %v307_v28, %v301_v45  ;;  %v316_v53 = vmul.f32 %v308_v29, %v301_v45  ;;  %v237_v62 = vmul.f32 %v231_v24, %v219_v30  ;;  %v238_v63 = vmul.f32 %v232_v25, %v219_v30 }
  0x8e   : > { %v233_v32 = vmul.f32 %v231_v24, %v209_v31  ;;  %v234_v33 = vmul.f32 %v232_v25, %v209_v31 }
  0x90   : > { %v275_v37 = vadd.f32 %v267_v26, %v233_v32  ;;  %v276_v38 = vadd.f32 %v268_v27, %v234_v33 }
  0x92   : > { %v317_v39 = vadd.f32 %v309_v35, %v275_v37  ;;  %v318_v40 = vadd.f32 %v310_v36, %v276_v38 }
  0x94   : > { %528 = vtanh.f32 %v317_v39  ;;  %v224_v41 = vpop.permute.xlu1 %223 }
  0x95   : > { %530 = vtanh.f32 %v318_v40  ;;  %v214_v42 = vpop.permute.xlu0 %213  ;;  %v239_v47 = vmul.f32 %v231_v24, %v224_v41  ;;  %v240_v48 = vmul.f32 %v232_v25, %v224_v41 }
  0x96   : > { %v235_v60 = vmul.f32 %v231_v24, %v214_v42  ;;  %v236_v61 = vmul.f32 %v232_v25, %v214_v42 }
  0x98   : > { %v277_v8 = vadd.f32 %v269_v0, %v235_v60  ;;  %v278_v9 = vadd.f32 %v270_v1, %v236_v61 }
  0x9a   : > { %v529_v43 = vpop.eup %528 }
  0x9b   : > { %v531_v44 = vpop.eup %530  ;;  %333 = vst [vmem:[%s712_s6] sm:$0xff] %v529_v43 }
  0x9c   : > { %334 = vst [vmem:[%s712_s6 + $0x8] sm:$0xff] %v531_v44  ;;  %v259_v46 = vpop.permute.xlu1 %258 }
  0x9d   : > { %v273_v49 = vmul.f32 %v265_v20, %v259_v46  ;;  %v274_v50 = vmul.f32 %v266_v21, %v259_v46  ;;  %v254_v51 = vpop.permute.xlu0 %253 }
  0x9e   : > { %v271_v58 = vmul.f32 %v265_v20, %v254_v51  ;;  %v272_v59 = vmul.f32 %v266_v21, %v254_v51 }
  0x9f   : > { %v281_v54 = vadd.f32 %v273_v49, %v239_v47  ;;  %v282_v55 = vadd.f32 %v274_v50, %v240_v48 }
  0xa0   : > { %v279_v3 = vadd.f32 %v271_v58, %v237_v62  ;;  %v280_v4 = vadd.f32 %v272_v59, %v238_v63 }
  0xa1   : > { %v323_v56 = vadd.f32 %v315_v52, %v281_v54  ;;  %v324_v57 = vadd.f32 %v316_v53, %v282_v55 }
  0xa3   : > { %532 = vtanh.f32 %v323_v56 }
  0xa4   : > { %534 = vtanh.f32 %v324_v57  ;;  %v296_v2 = vpop.permute.xlu1 %295 }
  0xa5   : > { %v313_v5 = vmul.f32 %v307_v28, %v296_v2  ;;  %v314_v6 = vmul.f32 %v308_v29, %v296_v2  ;;  %v291_v7 = vpop.permute.xlu0 %290 }
  0xa6   : > { %v311_v10 = vmul.f32 %v307_v28, %v291_v7  ;;  %v312_v11 = vmul.f32 %v308_v29, %v291_v7 }
  0xa7   : > { %v321_v12 = vadd.f32 %v313_v5, %v279_v3  ;;  %v322_v13 = vadd.f32 %v314_v6, %v280_v4 }
  0xa8   : > { %v319_v14 = vadd.f32 %v311_v10, %v277_v8  ;;  %v320_v15 = vadd.f32 %v312_v11, %v278_v9 }
  0xa9   : > { %v533_v16 = vpop.eup %532  ;;  %536 = vtanh.f32 %v321_v12 }
  0xaa   : > { %v535_v17 = vpop.eup %534  ;;  %339 = vst [vmem:[%s712_s6 + $0x30] sm:$0xff] %v533_v16  ;;  %538 = vtanh.f32 %v322_v13 }
  0xab   : > { %340 = vst [vmem:[%s712_s6 + $0x38] sm:$0xff] %v535_v17  ;;  %540 = vtanh.f32 %v319_v14 }
  0xac   : > { %542 = vtanh.f32 %v320_v15 }
  0xaf   : > { %v537_v18 = vpop.eup %536 }
  0xb0   : > { %v539_v19 = vpop.eup %538  ;;  %337 = vst [vmem:[%s712_s6 + $0x20] sm:$0xff] %v537_v18 }
  0xb1   : > { %v541_v20 = vpop.eup %540  ;;  %338 = vst [vmem:[%s712_s6 + $0x28] sm:$0xff] %v539_v19 }
  0xb2   : > { %v543_v21 = vpop.eup %542  ;;  %335 = vst [vmem:[%s712_s6 + $0x10] sm:$0xff] %v541_v20 }
  0xb3   : > { %336 = vst [vmem:[%s712_s6 + $0x18] sm:$0xff] %v543_v21 }
  0xb4   : > { %571 = shalt.err (!%p568_p5)
}
  0xb5   : > { %s625_s30 = smov 256   ;;  %s626_s3 = smov 16  }
  0xb6   : > { %467 = dma.vmem_to_hbm [thread:$0]  (%p682_p4), %s357_s12, 1024, %s359_s18, %s342_s20, %s625_s30, %s625_s30, %s626_s3  }
  0xb7 PF: > { %p473_p6 = scmp.ge.s32.totalorder %s622_s14, 2  ;;  %s373_s4 = sand.u32 1, %s602_s9  }
  0xb8   : > { %s374_s5 = scalar_lea.sflag [#allocation3], %s373_s4 }
  0xb9   : > { %p470_p7 = pnand %p473_p6, %p689_p8 }
  0xbb   : > { %p471_p9 = pneg %p470_p7 }
  0xbd   : > { %597 = dma.done.wait (%p471_p9), %s374_s5, 1024  }
  0xbe   : > { %599 = vsyncadd (%p471_p9), %s374_s5, 4294966272  ;;  %s15_s14 = sadd.s32 1, %s622_s14   ;;  %s766_s9 = smov %s606_s10 }
  0xbf   : > { %p12_p10 = scmp.ge.s32.totalorder %s15_s14, 4   ;;  %s767_s10 = smov %s610_s11 }
  0xc0   : > { %s768_s11 = smov %s695_s22  ;;  %s769_s12 = smov %s618_s13 }
  0xc1   : > { %s770_s13 = smov %s772_s17  ;;  %14 = sbr.rel (!%p12_p10) target bundleno = 4 (0x4), region = 66 }
  0xc6   :  { %380 = vsyncpa [#allocation3], 1 }
  0xc7   :  { %382 = vsyncpa [#allocation3 + $0x1], 1 }

</bundles_post_ra>
